<compile_context>
chip_gen: v6e
topology: v6e:2x2x1
jax: 0.10.0
libtpu: 0.0.40
codegen_flags: <defaults>
</compile_context>

<pallas_src>
import jax
import jax.numpy as jnp
from jax.experimental import pallas as pl
from jax.experimental.pallas import tpu as pltpu


# ----------------------------- budgets & tiling --------------------------------- #

def _tpu_budgets():
    """Generation-aware VMEM budgets.

    vmem_limit: explicit scoped-VMEM limit handed to Mosaic (~3/4 of capacity).
    slab1: per-block budget for pass 1 (only the input is pipelined -> ~2x slab live).
    slab2: per-block budget for pass 2 (input + output pipelined -> ~4x slab live).
    """
    vmem = None
    try:
        vmem = getattr(pltpu.get_tpu_info(), "vmem_capacity_bytes", None)
    except Exception:
        vmem = None
    if not vmem:
        vmem = 64 * 1024 * 1024            # conservative default: v7x per-TC VMEM
    vmem_limit = min((int(vmem) * 3) // 4, 112 * 1024 * 1024)
    slab1 = min(vmem_limit // 4, 24 * 1024 * 1024)   # v5e/v6e: 24 MiB, v7x: 12 MiB
    slab2 = min(vmem_limit // 8, 12 * 1024 * 1024)   # v5e/v6e: 12 MiB, v7x:  6 MiB
    return int(vmem_limit), int(slab1), int(slab2)


def _divisors(n):
    return [d for d in range(1, n + 1) if n % d == 0]


def _pick_tiles(rows, hw, itemsize, slab_bytes):
    """Pick (row_tile, lane_tile).

    row_tile: multiple-of-8 divisor of `rows` (or `rows` itself if none exists).
    lane_tile: multiple-of-128 divisor of `hw` (or `hw` itself — full extent is
    always a legal block dim). Maximizes slab usage under `slab_bytes`, preferring
    longer lane tiles (lane-dense DMA bursts, fewer reduce steps).
    """
    row_cands = [d for d in _divisors(rows) if d % 8 == 0] or [rows]
    lane_cands = [d for d in _divisors(hw) if d % 128 == 0] or [hw]
    best = (row_cands[0], lane_cands[0])           # smallest legal fallback
    best_key = (-1, -1)
    for r in row_cands:
        for l in lane_cands:
            b = r * l * itemsize
            if b <= slab_bytes and (b, l) > best_key:
                best, best_key = (r, l), (b, l)
    return best


def _ensure_multi_step(rows, hw, r_tile, hw_tile):
    """Prefer >= 2 grid steps so both v7x TensorCores get work (used for pass 2)."""
    if rows // r_tile > 1 or hw // hw_tile > 1:
        return r_tile, hw_tile
    lane_cands = [d for d in _divisors(hw) if d % 128 == 0 and d < hw_tile]
    if lane_cands:
        return r_tile, max(lane_cands)
    row_cands = [d for d in _divisors(rows) if d % 8 == 0 and d < r_tile]
    if row_cands:
        return max(row_cands), hw_tile
    return r_tile, hw_tile


# ---------------------------------- kernels ------------------------------------- #

def _make_moments_kernel(n_chunks, lane_dense):
    """Pass 1: accumulate spatial sum(x) and sum(x*x) per row.

    x_ref:   (r_tile, hw_tile) input block (native dtype)
    phi_ref: (1, r_tile, acc_lanes) f32 accumulator, resident across the HW grid axis
    psi_ref: (1, r_tile, acc_lanes) f32 accumulator
    lane_dense: accumulate 128-lane-wide partials with pure VALU adds (no XLU
    cross-lane reduce, no masked width-1 stores); final lane collapse happens in JAX.
    """
    def kernel(x_ref, phi_ref, psi_ref):
        @pl.when(pl.program_id(2) == 0)
        def _():
            phi_ref[...] = jnp.zeros_like(phi_ref)
            psi_ref[...] = jnp.zeros_like(psi_ref)

        if lane_dense:
            phi_acc = phi_ref[...]
            psi_acc = psi_ref[...]
            if n_chunks <= 8:
                for j in range(n_chunks):                      # short: fully unrolled
                    xc = x_ref[:, j * 128:(j + 1) * 128].astype(jnp.float32)
                    phi_acc = phi_acc + xc[None]
                    psi_acc = psi_acc + (xc * xc)[None]
            else:
                def body(j, carry):
                    pa, sa = carry
                    start = pl.multiple_of(j * 128, 128)
                    xc = x_ref[:, pl.ds(start, 128)].astype(jnp.float32)
                    return pa + xc[None], sa + (xc * xc)[None]
                phi_acc, psi_acc = jax.lax.fori_loop(
                    0, n_chunks, body, (phi_acc, psi_acc))
            phi_ref[...] = phi_acc
            psi_ref[...] = psi_acc
        else:
            # hw_tile not a multiple of 128 (full-extent fallback): plain reduce.
            x = x_ref[...].astype(jnp.float32)
            phi_ref[...] += jnp.sum(x, axis=-1, keepdims=True)[None]
            psi_ref[...] += jnp.sum(x * x, axis=-1, keepdims=True)[None]

    return kernel


def _apply_kernel(x_ref, st_ref, out_ref):
    """Pass 2: out = s * x + t with per-row fused scale/shift (one FMA per element)."""
    s = st_ref[:, 0:1]
    t = st_ref[:, 1:2]
    out_ref[...] = (s * x_ref[...] + t).astype(out_ref.dtype)


# ---------------------------------- wrapper ------------------------------------- #

def mode_norm(x_nchw, w, b, alpha, beta, *, n_components=None, eps=1e-5):
    """Mode normalization forward (training-mode statistics).

    x_nchw: (N, C, H, W) activations (f32 or bf16; output matches input dtype)
    w:      (K, C) gating weight,  b: (K,) gating bias
    alpha:  (C,) scale,  beta: (C,) shift
    """
    N, C, H, W = x_nchw.shape
    K = w.shape[0]
    if n_components is not None:
        assert n_components == K
    HW = H * W
    R = N * C

    vmem_limit, slab1, slab2 = _tpu_budgets()

    # 2D layout (N*C, HW): free reshape, dense sublane packing regardless of C.
    x2d = x_nchw.reshape(R, HW)
    itemsize = x2d.dtype.itemsize

    # ---- Pass 1: per-(n,c) spatial moments (HBM-bound reduce over x) ----
    r1, hw1 = _pick_tiles(R, HW, itemsize, slab1)
    n_r1 = R // r1
    if n_r1 == 1:
        # Single row step: try to split HW into an even number of blocks so a P=2
        # outer parallel factor can shard pass 1 across both v7x TensorCores.
        if HW // hw1 < 2 or (HW // hw1) % 2 != 0:
            cands = [d for d in _divisors(HW)
                     if d % 128 == 0 and d <= hw1 and (HW // d) % 2 == 0]
            if cands:
                hw1 = max(cands)
    n_hw1 = HW // hw1
    P = 2 if (n_r1 == 1 and n_hw1 >= 2 and n_hw1 % 2 == 0) else 1
    n_hw1_p = n_hw1 // P

    lane_dense = (hw1 % 128 == 0)
    acc_lanes = 128 if lane_dense else 1
    n_chunks = hw1 // 128 if lane_dense else 0

    x1_spec = pl.BlockSpec((r1, hw1), lambda p, r, j: (r, p * n_hw1_p + j))
    acc_spec = pl.BlockSpec((1, r1, acc_lanes), lambda p, r, j: (p, r, 0))

    phi_parts, psi_parts = pl.pallas_call(
        _make_moments_kernel(n_chunks, lane_dense),
        grid=(P, n_r1, n_hw1_p),
        in_specs=[x1_spec],
        out_specs=[acc_spec, acc_spec],
        out_shape=[jax.ShapeDtypeStruct((P, R, acc_lanes), jnp.float32),
                   jax.ShapeDtypeStruct((P, R, acc_lanes), jnp.float32)],
        compiler_params=pltpu.CompilerParams(
            dimension_semantics=("parallel", "parallel", "arbitrary"),
            vmem_limit_bytes=vmem_limit),
    )(x2d)

    # ---- Tiny gating / per-mode statistics: O(N*C*K) glue math in plain JAX ----
    inv_hw = jnp.float32(1.0 / HW)
    phi = (phi_parts.sum(axis=(0, 2)) * inv_hw).reshape(N, C)   # E_hw[x]
    psi = (psi_parts.sum(axis=(0, 2)) * inv_hw).reshape(N, C)   # E_hw[x^2]

    w32 = jnp.asarray(w, jnp.float32)                 # (K, C)
    b32 = jnp.asarray(b, jnp.float32).reshape(K)
    a32 = jnp.asarray(alpha, jnp.float32).reshape(C)
    be32 = jnp.asarray(beta, jnp.float32).reshape(C)

    logits = phi @ w32.T + b32                        # (N, K)
    g = jax.nn.softmax(logits, axis=1)                # (N, K) gates
    n_k = jnp.sum(g, axis=0)                          # (K,)
    gn = g / n_k[None, :]                             # gates pre-normalized by n_k
    mu = gn.T @ phi                                   # (K, C) weighted means
    ex2 = gn.T @ psi                                  # (K, C) weighted E[x^2]
    # NOTE: E[x^2]-E[x]^2 with f32 accumulation; clamp guards against cancellation.
    var = jnp.maximum(ex2 - mu * mu, 0.0)
    rstd = jax.lax.rsqrt(var + jnp.float32(eps))      # (K, C)

    # Fold per-mode normalization and alpha/beta into one scale/shift per (n,c):
    #   out = alpha * sum_k g[n,k]*(x - mu_k)*rstd_k + beta = s*x + t
    s = a32[None, :] * (g @ rstd)                            # (N, C)
    t = be32[None, :] - a32[None, :] * (g @ (mu * rstd))     # (N, C)
    # bf16 inputs: run the apply FMA in bf16 (native VPU on v6e/v7x; on v5e the
    # compiler legalizes to f32 and the pass stays HBM-bound). Otherwise f32.
    compute_dtype = jnp.bfloat16 if x2d.dtype == jnp.bfloat16 else jnp.float32
    st = jnp.concatenate([s.reshape(R, 1), t.reshape(R, 1)],
                         axis=1).astype(compute_dtype)       # (R, 2) fused s,t

    # ---- Pass 2: elementwise apply (one FMA per element, HBM-bound) ----
    r2, hw2 = _pick_tiles(R, HW, itemsize, slab2)
    r2, hw2 = _ensure_multi_step(R, HW, r2, hw2)
    x2_spec = pl.BlockSpec((r2, hw2), lambda r, j: (r, j))
    st_spec = pl.BlockSpec((r2, 2), lambda r, j: (r, 0))

    out2d = pl.pallas_call(
        _apply_kernel,
        grid=(R // r2, HW // hw2),
        in_specs=[x2_spec, st_spec],
        out_specs=x2_spec,
        out_shape=jax.ShapeDtypeStruct((R, HW), x2d.dtype),
        compiler_params=pltpu.CompilerParams(
            dimension_semantics=("parallel", "parallel"),
            vmem_limit_bytes=vmem_limit),
    )(x2d, st)
    # NOTE: input_output_aliases={0: 0} would let pass 2 overwrite x in place and
    # save an x-sized HBM allocation; left off so the caller's x stays untouched.
    return out2d.reshape(N, C, H, W)


# --------------------------------- reference ------------------------------------ #

def mode_norm_ref(x_nchw, w, b, alpha, beta, *, n_components, eps=1e-5):
    """Pure-JAX reference mirroring the PyTorch training-mode forward."""
    N, C, H, W = x_nchw.shape
    x = x_nchw.astype(jnp.float32)
    phi = x.mean(axis=(2, 3))                                   # (N, C)
    logits = phi @ w.T + b                                      # (N, K)
    g = jax.nn.softmax(logits, axis=1)                          # (N, K)
    n_k = g.sum(axis=0)                                         # (K,)
    x_split = jnp.zeros_like(x)
    for k in range(n_components):
        gk = g[:, k][:, None, None, None]                       # (N,1,1,1)
        mu = (gk * x).mean(axis=(2, 3), keepdims=True).sum(axis=0, keepdims=True) / n_k[k]
        var = (gk * (x - mu) ** 2).mean(axis=(2, 3), keepdims=True).sum(axis=0, keepdims=True) / n_k[k]
        x_split = x_split + gk * ((x - mu) / jnp.sqrt(var + eps))
    return alpha.reshape(1, C, 1, 1) * x_split + beta.reshape(1, C, 1, 1)


if __name__ == "__main__":
    key = jax.random.PRNGKey(0)
    N, C, H, W = 2, 4, 16, 16
    K = 3            # n_components
    eps = 1e-5

    k_x, k_w, k_b = jax.random.split(key, 3)
    x = jax.random.normal(k_x, (N, C, H, W), dtype=jnp.float32)

    # Deterministic parameter init, mirroring the module's __init__:
    #   W.weight = ones(K, C)/K + 0.01*randn(K, C);  W.bias ~ small random
    w = jnp.ones((K, C), jnp.float32) / K + 0.01 * jax.random.normal(k_w, (K, C), jnp.float32)
    b = 0.01 * jax.random.normal(k_b, (K,), jnp.float32)
    alpha = jnp.ones((C,), jnp.float32)   # nn.Parameter(torch.ones(1, dim, 1, 1))
    beta = jnp.zeros((C,), jnp.float32)   # nn.Parameter(torch.zeros(1, dim, 1, 1))

    out = mode_norm(x, w, b, alpha, beta, n_components=K, eps=eps)
    out = jax.block_until_ready(out)

    ref = mode_norm_ref(x, w, b, alpha, beta, n_components=K, eps=eps)
    assert out.shape == (N, C, H, W)
    assert out.dtype == x.dtype
    assert jnp.allclose(out, ref, atol=1e-4, rtol=1e-4), "mismatch vs pure-JAX reference"

    print("KERNEL_OK")
</pallas_src>

<mosaic_0001>
module attributes {stable_mosaic.version = 11 : i64} {
  func.func @kernel(%arg0: i32, %arg1: i32, %arg2: i32, %arg3: memref<8x128xf32, #tpu.memory_space<vmem>>, %arg4: memref<1x8x128xf32, #tpu.memory_space<vmem>>, %arg5: memref<1x8x128xf32, #tpu.memory_space<vmem>>) attributes {dimension_semantics = [#tpu.dimension_semantics<parallel>, #tpu.dimension_semantics<parallel>, #tpu.dimension_semantics<arbitrary>], iteration_bounds = array<i64: 2, 1, 1>, scalar_prefetch = 0 : i64, scratch_operands = 0 : i64, tpu.core_type = #tpu.core_type<tc>, window_params = [{transform_indices = @transform_0, window_bounds = array<i64: 8, 128>}, {transform_indices = @transform_1, window_bounds = array<i64: 1, 8, 128>}, {transform_indices = @transform_2, window_bounds = array<i64: 1, 8, 128>}]} {
    %c0_i32 = arith.constant 0 : i32
    %0 = arith.cmpi eq, %arg2, %c0_i32 : i32
    %1 = arith.extui %0 : i1 to i32
    %c0_i32_0 = arith.constant 0 : i32
    %2 = arith.cmpi ne, %1, %c0_i32_0 : i32
    scf.if %2 {
      %cst = arith.constant 0.000000e+00 : f32
      %13 = vector.broadcast %cst : f32 to vector<1x8x128xf32>
      %c0_14 = arith.constant 0 : index
      %c0_15 = arith.constant 0 : index
      %c0_16 = arith.constant 0 : index
      %14 = vector.load %arg4[%c0_14, %c0_15, %c0_16] : memref<1x8x128xf32, #tpu.memory_space<vmem>>, vector<1x8x128xf32>
      tpu.vector_store %arg4[%c0_14, %c0_15, %c0_16], %13 {strides = array<i32>} : memref<1x8x128xf32, #tpu.memory_space<vmem>>, vector<1x8x128xf32>,
      %cst_17 = arith.constant 0.000000e+00 : f32
      %15 = vector.broadcast %cst_17 : f32 to vector<1x8x128xf32>
      %c0_18 = arith.constant 0 : index
      %c0_19 = arith.constant 0 : index
      %c0_20 = arith.constant 0 : index
      %16 = vector.load %arg5[%c0_18, %c0_19, %c0_20] : memref<1x8x128xf32, #tpu.memory_space<vmem>>, vector<1x8x128xf32>
      tpu.vector_store %arg5[%c0_18, %c0_19, %c0_20], %15 {strides = array<i32>} : memref<1x8x128xf32, #tpu.memory_space<vmem>>, vector<1x8x128xf32>,
    } else {
    }
    %c0 = arith.constant 0 : index
    %c0_1 = arith.constant 0 : index
    %c0_2 = arith.constant 0 : index
    %3 = vector.load %arg4[%c0, %c0_1, %c0_2] : memref<1x8x128xf32, #tpu.memory_space<vmem>>, vector<1x8x128xf32>
    %c0_3 = arith.constant 0 : index
    %c0_4 = arith.constant 0 : index
    %c0_5 = arith.constant 0 : index
    %4 = vector.load %arg5[%c0_3, %c0_4, %c0_5] : memref<1x8x128xf32, #tpu.memory_space<vmem>>, vector<1x8x128xf32>
    %c0_6 = arith.constant 0 : index
    %c0_7 = arith.constant 0 : index
    %5 = vector.load %arg3[%c0_6, %c0_7] : memref<8x128xf32, #tpu.memory_space<vmem>>, vector<8x128xf32>
    %6 = vector.shape_cast %5 : vector<8x128xf32> to vector<1x8x128xf32>
    %7 = arith.addf %3, %6 : vector<1x8x128xf32>
    %8 = arith.mulf %5, %5 : vector<8x128xf32>
    %9 = vector.shape_cast %8 : vector<8x128xf32> to vector<1x8x128xf32>
    %10 = arith.addf %4, %9 : vector<1x8x128xf32>
    %c0_8 = arith.constant 0 : index
    %c0_9 = arith.constant 0 : index
    %c0_10 = arith.constant 0 : index
    %11 = vector.load %arg4[%c0_8, %c0_9, %c0_10] : memref<1x8x128xf32, #tpu.memory_space<vmem>>, vector<1x8x128xf32>
    tpu.vector_store %arg4[%c0_8, %c0_9, %c0_10], %7 {strides = array<i32>} : memref<1x8x128xf32, #tpu.memory_space<vmem>>, vector<1x8x128xf32>,
    %c0_11 = arith.constant 0 : index
    %c0_12 = arith.constant 0 : index
    %c0_13 = arith.constant 0 : index
    %12 = vector.load %arg5[%c0_11, %c0_12, %c0_13] : memref<1x8x128xf32, #tpu.memory_space<vmem>>, vector<1x8x128xf32>
    tpu.vector_store %arg5[%c0_11, %c0_12, %c0_13], %10 {strides = array<i32>} : memref<1x8x128xf32, #tpu.memory_space<vmem>>, vector<1x8x128xf32>,
    return
  }
  func.func @transform_0(%arg0: i32, %arg1: i32, %arg2: i32) -> (i32, i32) {
    %c1_i32 = arith.constant 1 : i32
    %0 = arith.muli %arg0, %c1_i32 : i32
    %1 = arith.addi %0, %arg2 : i32
    %c0_i32 = arith.constant 0 : i32
    return %arg1, %1 : i32, i32
  }
  func.func @transform_1(%arg0: i32, %arg1: i32, %arg2: i32) -> (i32, i32, i32) {
    %c0_i32 = arith.constant 0 : i32
    %c0_i32_0 = arith.constant 0 : i32
    return %arg0, %arg1, %c0_i32 : i32, i32, i32
  }
  func.func @transform_2(%arg0: i32, %arg1: i32, %arg2: i32) -> (i32, i32, i32) {
    %c0_i32 = arith.constant 0 : i32
    %c0_i32_0 = arith.constant 0 : i32
    return %arg0, %arg1, %c0_i32 : i32, i32, i32
  }
}

</mosaic_0001>

<bundles_post_ra>
// kernel: tpu_custom_call.1
= control target key start
LH: loop header
LB: loop body
LE: loop exit
PB: predicated region body
PF: predicated region fallthrough
CT: control target
= control target key end

     0   :  { %8 = vsyncpa [#allocation3], 0  ;;  %s792_s0 = inlined_call_operand.hbm [shape: f32[8,256], index: 0, kind: input, shape index: {}]   ;;  %s793_s1 = inlined_call_operand.hbm [shape: f32[2,8,128], index: 1, kind: output, shape index: {0}]   ;;  %s794_s2 = inlined_call_operand.hbm [shape: f32[2,8,128], index: 2, kind: output, shape index: {1}]  }
   0x1   :  { %10 = vsyncpa [#allocation3 + $0x1], 0 }
   0x2   :  { %11 = vsyncpa [#allocation4], 0 }
   0x3   :  { %13 = vsyncpa [#allocation4 + $0x1], 0 }
   0x4   :  { %14 = vsyncpa [#allocation7], 0 }
   0x5   :  { %16 = vsyncpa [#allocation7 + $0x1], 0  ;;  %s609_s9 = smov 0   ;;  %s611_s10 = smov 0  }
   0x6   :  { %s613_s11 = smov 0   ;;  %s615_s12 = smov 0  }
   0x7   :  { %s617_s13 = smov 0   ;;  %s619_s14 = smov 0  }
   0x8 LB: > { %s367_s15 = sadd.s32 4294967295, %s589_s14   ;;  %s368_s16 = sadd.s32 4294967294, %s589_s14   ;;  %s589_s14 = sphi %s619_s14, %s22_s14   ;;  %s585_s13 = sphi %s617_s13, %s806_s13   ;;  %s581_s12 = sphi %s615_s12, %s805_s12   ;;  %s577_s11 = sphi %s613_s11, %s804_s11   ;;  %s573_s10 = sphi %s611_s10, %s803_s10   ;;  %s569_s9 = sphi %s609_s9, %s802_s9  }
   0x9   : > { %s41_s17 = sadd.s32 1, %s585_s13  ;;  %s52_s18 = sadd.s32 1, %s577_s11 }
   0xa   : > { %p43_p0 = scmp.ge.s32.totalorder %s41_s17, 2  ;;  %p59_p1 = scmp.ne.s32.totalorder %s577_s11, %s573_s10 }
   0xb   : > { %p60_p2 = scmp.eq.s32.totalorder %s589_s14, 0  ;;  %p65_p3 = scmp.ne.s32.totalorder %s573_s10, %s569_s9 }
   0xc   : > { %s808_s17 = smov (%p43_p0, %s41_s17), 0  ;;  %p66_p5 = scmp.eq.s32.totalorder %s367_s15, 0 }
   0xd   : > { %p650_p4 = por %p60_p2, %p59_p1  ;;  %s48_s20 = ssub.s32 %s585_s13, %s808_s17 }
   0xe   : > { %p91_p6 = scmp.eq.s32.totalorder %s367_s15, 1  ;;  %p50_p7 = scmp.eq.s32.totalorder %s48_s20, 0 }
   0xf   : > { %p656_p8 = por %p66_p5, %p65_p3  ;;  %p97_p10 = scmp.eq.s32.totalorder %s368_s16, 1 }
  0x10   : > { %p660_p9 = por %p91_p6, %p59_p1  ;;  %p400_p13 = scmp.lt.s32.totalorder %s589_s14, 2 }
  0x11   : > { %s665_s23 = scalar_select %p50_p7, %s577_s11, %s52_s18  }
  0x12   : > { %p667_p11 = por %p97_p10, %p65_p3  ;;  %s145_s25 = sand.u32 1, %s577_s11  }
  0x13   : > { %s371_s26 = sshll.u32 %s145_s25, 3  ;;  %s372_s27 = sshll.u32 %s585_s13, 7 }
  0x14   : > { %s798_s24 = scalar_select %p667_p11, 1, 0 }
  0x15   : > { %s157_s30 = scalar_lea.hbm %s792_s0, %s372_s27  ;;  %s149_s3 = scalar_lea.vmem [#allocation2], %s371_s26 }
  0x16   : > { %s159_s4 = sshll.u32 %s149_s3, 4  ;;  %p680_p0 = pnand %p400_p13, %p650_p4  ;;  %s160_s4 = int_to_ptr.vmem [resolvable:$true] %s159_s4 }
  0x17   : > { %p373_p1 = scmp.ge.s32.totalorder %s589_s14, 1  ;;  %p164_p2 = scmp.lt.s32.totalorder %s589_s14, 3 }
  0x18   : > { %s146_s6 = scalar_lea.sflag [#allocation3], %s145_s25  ;;  %p453_p3 = pneg %p680_p0 }
  0x19   : > { %s464_s7 = scalar_lea.vmem %s160_s4, 128  ;;  %s591_s8 = smov [#allocation2]  }
  0x1a   : > { %p465_p5 = scmp.ne.s32.totalorder %s160_s4, %s464_s7  ;;  %s469_s15 = sshll.u32 %s591_s8, 4  ;;  %s470_s15 = int_to_ptr.vmem [resolvable:$false] %s469_s15 }
  0x1b   : > { %s471_s16 = scalar_lea.vmem %s470_s15, 256  ;;  %p472_p10 = scmp.lt.s32.totalorder %s160_s4, %s470_s15 }
  0x1c   : > { %p467_p6 = pnand %p465_p5, %p453_p3  ;;  %p473_p12 = scmp.lt.s32.totalorder %s471_s16, %s464_s7 }
  0x1e   : > { %p468_p7 = pneg %p467_p6  ;;  %p474_p4 = por %p473_p12, %p472_p10 }
  0x20   : > { %p475_p13 = pnand %p474_p4, %p468_p7 }
  0x22   : > { %478 = shalt.err (!%p475_p13)
}
  0x23   : > { %392 = dma.hbm_to_vmem [thread:$0]  (!%p680_p0), %s157_s30, 128, %s160_s4, %s146_s6  }
  0x24   : > { %p165_p11 = pnand %p373_p1, %p164_p2 }
  0x25   : > { %s695_s18 = sand.u32 (!%p165_p11), 1, %s573_s10  }
  0x26   : > { %168 = sbr.rel (%p165_p11) target bundleno = 91 (0x5b), region = 24  ;;  %s698_s19 = sshll.u32 (!%p165_p11), %s695_s18, 3 }
  0x27   : > { %s171_s20 = scalar_lea.sflag (!%p165_p11), [#allocation3], %s695_s18  ;;  %s174_s25 = scalar_lea.vmem (!%p165_p11), [#allocation2], %s698_s19 }
  0x2b   : > { %556 = dma.done.wait (%p656_p8), %s171_s20, 128  }
  0x2c   : > { %558 = vsyncadd (%p656_p8), %s171_s20, 4294967168  ;;  %s379_s26 = sshll.u32 %s581_s12, 7  ;;  %s192_s27 = scalar_lea.vmem [#allocation5], %s698_s19  ;;  %v209_v0 = vld [vmem:[%s174_s25] sm:$0xff] }
  0x2d   : > { %s235_s28 = sshll.u32 %s192_s27, 4  ;;  %s199_s29 = scalar_lea.vmem [#allocation6], %s698_s19  ;;  %v211_v1 = vmul.f32 %v209_v0, %v209_v0  ;;  %213 = vst [vmem:[%s192_s27] sm:$0xff] %v209_v0  ;;  %s716_s28 = int_to_ptr.vmem [resolvable:$true] %s235_s28 }
  0x2e   : > { %s249_s30 = sshll.u32 %s199_s29, 4  ;;  %s714_s5 = scalar_lea.hbm %s793_s1, %s379_s26  ;;  %s723_s30 = int_to_ptr.vmem [resolvable:$true] %s249_s30 }
  0x2f   : > { %s721_s6 = scalar_lea.hbm %s794_s2, %s379_s26  ;;  %s216_s7 = scalar_lea.sflag [#allocation4], %s695_s18 }
  0x30   : > { %s479_s8 = scalar_lea.vmem %s716_s28, 128  ;;  %s592_s15 = smov [#allocation5]  }
  0x31   : > { %p480_p8 = scmp.ne.s32.totalorder %s716_s28, %s479_s8  ;;  %s483_s16 = sshll.u32 %s592_s15, 4  ;;  %s484_s16 = int_to_ptr.vmem [resolvable:$false] %s483_s16 }
  0x32   : > { %s485_s20 = scalar_lea.vmem %s484_s16, 256  ;;  %p486_p0 = scmp.lt.s32.totalorder %s716_s28, %s484_s16 }
  0x33   : > { %p481_p11 = pnand %p480_p8, %p660_p9  ;;  %p487_p1 = scmp.lt.s32.totalorder %s485_s20, %s479_s8 }
  0x35   : > { %p482_p12 = pneg %p481_p11  ;;  %p488_p2 = por %p487_p1, %p486_p0 }
  0x37   : > { %p489_p3 = pnand %p488_p2, %p482_p12 }
  0x39   : > { %492 = shalt.err (!%p489_p3)
}
  0x3a   : > { %s493_s25 = scalar_lea.hbm %s714_s5, 128  ;;  %s497_s3 = scalar_lea.hbm %s793_s1, 256 }
  0x3b   : > { %p494_p5 = scmp.ne.s32.totalorder %s714_s5, %s493_s25  ;;  %p498_p10 = scmp.lt.s32.totalorder %s714_s5, %s793_s1 }
  0x3c   : > { %p499_p4 = scmp.lt.s32.totalorder %s497_s3, %s493_s25 }
  0x3d   : > { %p495_p6 = pnand %p494_p5, %p660_p9 }
  0x3e   : > { %p500_p13 = por %p499_p4, %p498_p10 }
  0x3f   : > { %p496_p7 = pneg %p495_p6 }
  0x41   : > { %p501_p8 = pnand %p500_p13, %p496_p7 }
  0x43   : > { %504 = shalt.err (!%p501_p8)
}
  0x44   : > { %385 = dma.vmem_to_hbm [thread:$0]  (%p660_p9), %s716_s28, 128, %s714_s5, %s216_s7   ;;  %214 = vst [vmem:[%s199_s29] sm:$0xff] %v211_v1 }
  0x45   : > { %s221_s12 = scalar_lea.sflag [#allocation7], %s695_s18  ;;  %s505_s8 = scalar_lea.vmem %s723_s30, 128 }
  0x46   : > { %p506_p11 = scmp.ne.s32.totalorder %s723_s30, %s505_s8  ;;  %s593_s15 = smov [#allocation6]  }
  0x47   : > { %s509_s16 = sshll.u32 %s593_s15, 4  ;;  %s510_s16 = int_to_ptr.vmem [resolvable:$false] %s509_s16 }
  0x48   : > { %p507_p12 = pnand %p506_p11, %p660_p9  ;;  %s511_s20 = scalar_lea.vmem %s510_s16, 256 }
  0x49   : > { %p512_p1 = scmp.lt.s32.totalorder %s723_s30, %s510_s16  ;;  %p513_p2 = scmp.lt.s32.totalorder %s511_s20, %s505_s8 }
  0x4a   : > { %p508_p0 = pneg %p507_p12 }
  0x4b   : > { %p514_p3 = por %p513_p2, %p512_p1 }
  0x4d   : > { %p515_p5 = pnand %p514_p3, %p508_p0 }
  0x4f   : > { %518 = shalt.err (!%p515_p5)
}
  0x50   : > { %s519_s19 = scalar_lea.hbm %s721_s6, 128  ;;  %s523_s29 = scalar_lea.hbm %s794_s2, 256 }
  0x51   : > { %p520_p6 = scmp.ne.s32.totalorder %s721_s6, %s519_s19  ;;  %p524_p4 = scmp.lt.s32.totalorder %s721_s6, %s794_s2 }
  0x52   : > { %p525_p13 = scmp.lt.s32.totalorder %s523_s29, %s519_s19 }
  0x53   : > { %p521_p7 = pnand %p520_p6, %p660_p9 }
  0x54   : > { %p526_p8 = por %p525_p13, %p524_p4 }
  0x55   : > { %p522_p10 = pneg %p521_p7 }
  0x57   : > { %p527_p11 = pnand %p526_p8, %p522_p10 }
  0x59   : > { %530 = shalt.err (!%p527_p11)
}
  0x5a   : > { %386 = dma.vmem_to_hbm [thread:$0]  (%p660_p9), %s723_s30, 128, %s721_s6, %s221_s12  }
  0x5b PF: > { %s261_s25 = sand.u32 1, %s569_s9   ;;  %p800_p12 = scmp.ne.s32.totalorder %s798_s24, 0 }
  0x5c   : > { %p801_p0 = scmp.ge.s32.totalorder %s589_s14, 2  ;;  %s262_s26 = scalar_lea.sflag [#allocation4], %s261_s25 }
  0x5e   : > { %p394_p1 = pnand %p801_p0, %p800_p12 }
  0x60   : > { %p395_p2 = pneg %p394_p1 }
  0x62   : > { %560 = dma.done.wait (%p395_p2), %s262_s26, 128  }
  0x63   : > { %562 = vsyncadd (%p395_p2), %s262_s26, 4294967168  ;;  %s271_s27 = scalar_lea.sflag [#allocation7], %s261_s25 }
  0x64   : > { %564 = dma.done.wait (%p395_p2), %s271_s27, 128  }
  0x65   : > { %566 = vsyncadd (%p395_p2), %s271_s27, 4294967168  ;;  %s22_s14 = sadd.s32 1, %s589_s14   ;;  %s802_s9 = smov %s573_s10 }
  0x66   : > { %p19_p3 = scmp.ge.s32.totalorder %s22_s14, 4   ;;  %s803_s10 = smov %s577_s11 }
  0x67   : > { %s804_s11 = smov %s665_s23  ;;  %s805_s12 = smov %s585_s13 }
  0x68   : > { %s806_s13 = smov %s808_s17  ;;  %21 = sbr.rel (!%p19_p3) target bundleno = 8 (0x8), region = 90 }
  0x6d   :  { %276 = vsyncpa [#allocation3], 1 }
  0x6e   :  { %278 = vsyncpa [#allocation3 + $0x1], 1 }
  0x6f   :  { %279 = vsyncpa [#allocation4], 1 }
  0x70   :  { %281 = vsyncpa [#allocation4 + $0x1], 1 }
  0x71   :  { %282 = vsyncpa [#allocation7], 1 }
  0x72   :  { %284 = vsyncpa [#allocation7 + $0x1], 1 }

</bundles_post_ra>
